<compile_context>
chip_gen: v7x
topology: tpu7x:2x2x1
jax: 0.10.0
libtpu: 0.0.40
codegen_flags: <defaults>
</compile_context>

<pallas_src>
import functools

import jax
import jax.numpy as jnp
from jax.experimental import pallas as pl
from jax.experimental.pallas import tpu as pltpu


def _round_up(x, m):
    return ((x + m - 1) // m) * m


def _cdiv(a, b):
    return (a + b - 1) // b


def _protonet_kernel(x_ref, ct_ref, c2_ref, out_ref):
    """softmax(-cdist(X, centers), axis=-1) for one tile of query rows.

    x_ref:   (TN, D) float32 block of queries
    ct_ref:  (D, C)  float32 transposed prototypes (grid-invariant)
    c2_ref:  (1, C)  float32 precomputed ||centers||^2
    out_ref: (TN, C) float32 probabilities
    """
    x = x_ref[...]                      # (TN, D)
    ct = ct_ref[...]                    # (D, C)
    c2 = c2_ref[...]                    # (1, C)

    # Squared euclidean distance via ||x||^2 + ||c||^2 - 2 x.c (MXU matmul,
    # canonical (TN,D)@(D,C) contraction -> no RHS transpose in the kernel).
    x2 = jnp.sum(x * x, axis=-1, keepdims=True)                       # (TN, 1)
    xc = jax.lax.dot_general(
        x, ct,
        dimension_numbers=(((1,), (0,)), ((), ())),
        preferred_element_type=jnp.float32,
    )                                                                  # (TN, C)
    d2 = jnp.maximum(x2 + c2 - 2.0 * xc, 0.0)
    dists = jnp.sqrt(d2)                                               # (TN, C)

    # Max-stabilized softmax(-dists) over the class axis.
    logits = -dists
    m = jnp.max(logits, axis=-1, keepdims=True)
    e = jnp.exp(logits - m)
    denom = jnp.sum(e, axis=-1, keepdims=True)
    # EUP approximate reciprocal + one Newton refinement (~f32 accuracy),
    # keeps the divide off the VALU slot.
    r = pl.reciprocal(denom, approx=True)
    r = r * (2.0 - denom * r)
    out_ref[...] = (e * r).astype(out_ref.dtype)


def _pick_row_tile(n, row_tile):
    """Largest row tile <= row_tile covering N, with >=2 grid steps when each
    half-tile is still >=128 rows (so v7x's two TensorCores both get work)."""
    tn = min(_round_up(int(row_tile), 8), _round_up(n, 8))
    half = _round_up(_cdiv(n, 2), 8)
    if half >= 128:
        tn = min(tn, half)
    return max(8, tn)


@functools.partial(jax.jit, static_argnames=("row_tile",))
def protonet_forward(x, centers, *, row_tile=512):
    """x: (N, D), centers: (C, D) -> probs (N, C) float32."""
    x = jnp.asarray(x, jnp.float32)
    centers = jnp.asarray(centers, jnp.float32)
    n, d = x.shape
    c, dc = centers.shape
    assert d == dc, "feature dims of queries and prototypes must match"

    # Hoisted prototype preprocessing: transpose to (D, C) and precompute
    # squared norms once (removes per-step O(C*D) VPU work + layout work).
    centers_t = centers.T                                             # (D, C)
    c2 = jnp.sum(centers * centers, axis=-1)[None, :]                 # (1, C)

    # Row tile + grid: no N padding, Pallas masks the ragged tail block.
    tn = _pick_row_tile(n, row_tile)
    grid = (_cdiv(n, tn),)

    # VMEM budget: double-buffered x tile + out tile, resident prototypes/
    # norms (double-buffered by BlockSpec), plus headroom; capped strictly
    # below physical VMEM (v7x: 64 MiB per TensorCore).
    need = 4 * (2 * tn * d + 2 * d * c + 2 * c + 2 * tn * c) + (4 << 20)
    try:
        phys = int(pltpu.get_tpu_info().vmem_capacity_bytes)
    except Exception:  # pragma: no cover - conservative fallback
        phys = 64 << 20
    vmem_cap = max(32 << 20, phys - (16 << 20))
    vmem_limit = int(min(max(need, 32 << 20), vmem_cap))

    out = pl.pallas_call(
        _protonet_kernel,
        out_shape=jax.ShapeDtypeStruct((n, c), jnp.float32),
        grid_spec=pltpu.PrefetchScalarGridSpec(
            num_scalar_prefetch=0,
            grid=grid,
            in_specs=[
                pl.BlockSpec((tn, d), lambda i: (i, 0)),   # query rows
                pl.BlockSpec((d, c), lambda i: (0, 0)),    # prototypes (D, C)
                pl.BlockSpec((1, c), lambda i: (0, 0)),    # ||centers||^2
            ],
            out_specs=pl.BlockSpec((tn, c), lambda i: (i, 0)),
        ),
        compiler_params=pltpu.CompilerParams(
            dimension_semantics=("parallel",),
            vmem_limit_bytes=vmem_limit,
        ),
    )(x, centers_t, c2)

    return out


def compute_prototypes(support_x, support_y, num_classes):
    """Plain-JAX glue replicating support_set.groupby().mean():
    per-class mean of support embeddings, stacked in label order 0..C-1."""
    support_x = jnp.asarray(support_x, jnp.float32)
    onehot = jax.nn.one_hot(support_y, num_classes, dtype=jnp.float32)  # (S, C)
    sums = onehot.T @ support_x                                         # (C, D)
    counts = jnp.sum(onehot, axis=0)[:, None]                           # (C, 1)
    return sums / counts


def _reference(x, centers):
    x = jnp.asarray(x, jnp.float32)
    centers = jnp.asarray(centers, jnp.float32)
    diff = x[:, None, :] - centers[None, :, :]
    dists = jnp.sqrt(jnp.sum(diff * diff, axis=-1))
    return jax.nn.softmax(-dists, axis=1)


def _check(query_x, centers, row_tile):
    probs = protonet_forward(query_x, centers, row_tile=row_tile)
    probs = jax.block_until_ready(probs)
    ref = _reference(query_x, centers)
    assert probs.shape == ref.shape, (probs.shape, ref.shape)
    assert jnp.allclose(probs, ref, atol=5e-5, rtol=5e-5), (
        f"max abs err {jnp.max(jnp.abs(probs - ref))}")
    assert jnp.allclose(jnp.sum(probs, axis=1), 1.0, atol=1e-4)
    return probs


if __name__ == "__main__":
    key = jax.random.PRNGKey(0)
    k_sup, k_query, k_x2, k_c2 = jax.random.split(key, 4)

    # Small few-shot setup: C=4 classes, 5 shots, D=32, N=8 query samples.
    num_classes = 4
    shots = 5
    feat_dim = 32
    num_query = 8

    support_x = jax.random.normal(
        k_sup, (num_classes * shots, feat_dim), dtype=jnp.float32)
    support_y = jnp.repeat(jnp.arange(num_classes), shots)
    query_x = jax.random.normal(
        k_query, (num_query, feat_dim), dtype=jnp.float32)

    centers = compute_prototypes(support_x, support_y, num_classes)
    _check(query_x, centers, row_tile=512)

    # Second case exercising ragged-tail + multi-step grid paths:
    # N not a multiple of the tile, C < 128 (unpadded class axis).
    x_big = jax.random.normal(k_x2, (300, 64), dtype=jnp.float32)
    centers_big = jax.random.normal(k_c2, (10, 64), dtype=jnp.float32)
    _check(x_big, centers_big, row_tile=128)

    print("KERNEL_OK")
</pallas_src>

<mosaic_0001>
module attributes {stable_mosaic.version = 11 : i64} {
  func.func @_protonet_kernel(%arg0: i32, %arg1: memref<8x32xf32, #tpu.memory_space<vmem>>, %arg2: memref<32x4xf32, #tpu.memory_space<vmem>>, %arg3: memref<1x4xf32, #tpu.memory_space<vmem>>, %arg4: memref<8x4xf32, #tpu.memory_space<vmem>>) attributes {dimension_semantics = [#tpu.dimension_semantics<parallel>], iteration_bounds = array<i64: 1>, scalar_prefetch = 0 : i64, scratch_operands = 0 : i64, tpu.core_type = #tpu.core_type<tc>, window_params = [{transform_indices = @transform_0, window_bounds = array<i64: 8, 32>}, {pipeline_mode = #tpu.pipeline_mode<synchronous>, transform_indices = @transform_1, window_bounds = array<i64: 32, 4>}, {pipeline_mode = #tpu.pipeline_mode<synchronous>, transform_indices = @transform_2, window_bounds = array<i64: 1, 4>}, {transform_indices = @transform_3, window_bounds = array<i64: 8, 4>}]} {
    %c0 = arith.constant 0 : index
    %c0_0 = arith.constant 0 : index
    %0 = vector.load %arg1[%c0, %c0_0] : memref<8x32xf32, #tpu.memory_space<vmem>>, vector<8x32xf32>
    %c0_1 = arith.constant 0 : index
    %c0_2 = arith.constant 0 : index
    %1 = vector.load %arg2[%c0_1, %c0_2] : memref<32x4xf32, #tpu.memory_space<vmem>>, vector<32x4xf32>
    %c0_3 = arith.constant 0 : index
    %c0_4 = arith.constant 0 : index
    %2 = vector.load %arg3[%c0_3, %c0_4] : memref<1x4xf32, #tpu.memory_space<vmem>>, vector<1x4xf32>
    %3 = arith.mulf %0, %0 : vector<8x32xf32>
    %cst = arith.constant dense<0.000000e+00> : vector<8xf32>
    %4 = vector.multi_reduction <add>, %3, %cst [1] : vector<8x32xf32> to vector<8xf32>
    %5 = vector.shape_cast %4 : vector<8xf32> to vector<8x1xf32>
    %cst_5 = arith.constant dense<0.000000e+00> : vector<8x4xf32>
    %6 = tpu.matmul %0, %1, %cst_5 {dimension_numbers = #tpu.dot_dimension_numbers<[1], [0], [0], [1], [0, 0, 1, 1], [], []>} : vector<8x32xf32>, vector<32x4xf32>, vector<8x4xf32> -> vector<8x4xf32>
    %7 = vector.broadcast %5 : vector<8x1xf32> to vector<8x4xf32>
    %8 = vector.broadcast %2 : vector<1x4xf32> to vector<8x4xf32>
    %9 = arith.addf %7, %8 : vector<8x4xf32>
    %cst_6 = arith.constant 2.000000e+00 : f32
    %10 = vector.broadcast %cst_6 : f32 to vector<8x4xf32>
    %11 = arith.mulf %10, %6 : vector<8x4xf32>
    %12 = arith.subf %9, %11 : vector<8x4xf32>
    %cst_7 = arith.constant 0.000000e+00 : f32
    %13 = vector.broadcast %cst_7 : f32 to vector<8x4xf32>
    %14 = arith.maximumf %12, %13 : vector<8x4xf32>
    %15 = math.sqrt %14 : vector<8x4xf32>
    %cst_8 = arith.constant 0.000000e+00 : f32
    %16 = vector.broadcast %cst_8 : f32 to vector<8x4xf32>
    %17 = arith.subf %16, %15 : vector<8x4xf32>
    %cst_9 = arith.constant dense<0xFF800000> : vector<8xf32>
    %18 = vector.multi_reduction <maximumf>, %17, %cst_9 [1] : vector<8x4xf32> to vector<8xf32>
    %19 = vector.shape_cast %18 : vector<8xf32> to vector<8x1xf32>
    %20 = vector.broadcast %19 : vector<8x1xf32> to vector<8x4xf32>
    %21 = arith.subf %17, %20 : vector<8x4xf32>
    %22 = math.exp %21 : vector<8x4xf32>
    %cst_10 = arith.constant dense<0.000000e+00> : vector<8xf32>
    %23 = vector.multi_reduction <add>, %22, %cst_10 [1] : vector<8x4xf32> to vector<8xf32>
    %24 = vector.shape_cast %23 : vector<8xf32> to vector<8x1xf32>
    %25 = tpu.reciprocal %24 {approx = true} : vector<8x1xf32> -> vector<8x1xf32>
    %26 = arith.mulf %24, %25 : vector<8x1xf32>
    %cst_11 = arith.constant 2.000000e+00 : f32
    %27 = vector.broadcast %cst_11 : f32 to vector<8x1xf32>
    %28 = arith.subf %27, %26 : vector<8x1xf32>
    %29 = arith.mulf %25, %28 : vector<8x1xf32>
    %30 = vector.broadcast %29 : vector<8x1xf32> to vector<8x4xf32>
    %31 = arith.mulf %22, %30 : vector<8x4xf32>
    %c0_12 = arith.constant 0 : index
    %c0_13 = arith.constant 0 : index
    %32 = vector.load %arg4[%c0_12, %c0_13] : memref<8x4xf32, #tpu.memory_space<vmem>>, vector<8x4xf32>
    tpu.vector_store %arg4[%c0_12, %c0_13], %31 {strides = array<i32>} : memref<8x4xf32, #tpu.memory_space<vmem>>, vector<8x4xf32>,
    return
  }
  func.func @transform_0(%arg0: i32) -> (i32, i32) {
    %c0_i32 = arith.constant 0 : i32
    %c0_i32_0 = arith.constant 0 : i32
    return %arg0, %c0_i32 : i32, i32
  }
  func.func @transform_1(%arg0: i32) -> (i32, i32) {
    %c0_i32 = arith.constant 0 : i32
    %c0_i32_0 = arith.constant 0 : i32
    %c0_i32_1 = arith.constant 0 : i32
    return %c0_i32, %c0_i32_0 : i32, i32
  }
  func.func @transform_2(%arg0: i32) -> (i32, i32) {
    %c0_i32 = arith.constant 0 : i32
    %c0_i32_0 = arith.constant 0 : i32
    %c0_i32_1 = arith.constant 0 : i32
    return %c0_i32, %c0_i32_0 : i32, i32
  }
  func.func @transform_3(%arg0: i32) -> (i32, i32) {
    %c0_i32 = arith.constant 0 : i32
    %c0_i32_0 = arith.constant 0 : i32
    return %arg0, %c0_i32 : i32, i32
  }
}

</mosaic_0001>

<bundles_post_ra>
// kernel: protonet_forward.1
= control target key start
LH: loop header
LB: loop body
LE: loop exit
PB: predicated region body
PF: predicated region fallthrough
CT: control target
= control target key end

     0   :  { %v169_v0 = vmov 0.0|0.0   ;;  %vm170_vm0 = vmmov 0   ;;  %v171_v4 = vmov 0.0   ;;  %vm21_vm1 = vcmask 261120   ;;  %s216_s1 = inlined_call_operand.vmem [shape: f32[32,4], index: 1, kind: input, shape index: {}]   ;;  %s217_s0 = inlined_call_operand.vmem [shape: f32[8,32], index: 0, kind: input, shape index: {}]   ;;  %s218_s2 = inlined_call_operand.vmem [shape: f32[1,4], index: 2, kind: input, shape index: {}]   ;;  %s219_s3 = inlined_call_operand.vmem [shape: f32[8,4], index: 3, kind: output, shape index: {}]  }
   0x1   :  { %154 = vmatprep.subr.bf16.mxu0 %v169_v0  ;;  %v15_v1 = vld [vmem:[%s216_s1] sm:$0xff]  ;;  %v16_v2 = vld [vmem:[%s216_s1 + $0x8] sm:$0xff]  ;;  %v17_v3 = vld [vmem:[%s216_s1 + $0x10] sm:$0xff]  ;;  %151 = vmatprep.mubr.msk.f32.mxu0 %vm170_vm0, %v171_v4  ;;  %vm116_vm4 = vcmask 31744  }
   0x2   :  { %v155_v5 = vpack.c.bf16 %v16_v2, %v15_v1  ;;  %v18_v6 = vld [vmem:[%s216_s1 + $0x18] sm:$0xff]  ;;  %v14_v7 = vld [vmem:[%s217_s0] sm:$0xff] }
   0x3   :  { %v20_v8 = vmul.f32 %v14_v7, %v14_v7  ;;  %v158_v9 = vpack.c.bf16 %v18_v6, %v17_v3  ;;  %v137_v11 = vld [vmem:[%s218_s2] ss:$0 sm:$0xff] }
   0x4   :  { %156 = vmatpush3.bf16.msra.mxu0 %v155_v5 }
   0x5   :  { %157 = vmatprep.subr.bf16.mxu0 %v169_v0  ;;  %v22_v10 = vsel %vm21_vm1, %v20_v8, 0.0 }
   0x6   :  { %23 = vadd.xlane.f32.xlu0 %v22_v10 }
   0x8   :  { %159 = vmatpush3.bf16.msra.mxu0 %v158_v9 }
   0xb   :  { %152 = vmatmul.mubr.msk.f32.vlgmr.msra.gmra.mrb[0].mxu0 %vm21_vm1, %v14_v7 }
  0x93   :  { %v24_v12 = vpop.xlane.xlu0 %23 }
  0x94   :  { %v104_v13 = vadd.f32 %v137_v11, %v24_v12 }
  0xde   :  { %v94_v14 = vpop.f32.mrb[0].mxu0 }
  0xdf   :  { %v105_v15 = vmul.f32 2.0, %v94_v14  ;;  %v153_v16 = vpop.f32.mrb[1].mxu0 }
  0xe1   :  { %v106_v17 = vsub.f32 %v104_v13, %v105_v15 }
  0xe3   :  { %v107_v18 = vmax.f32 %v106_v17, 0.0 }
  0xe5   :  { %163 = vrsqrt.f32 %v107_v18  ;;  %vm110_vm2 = vcmp.eq.f32.partialorder %v107_v18, inf  ;;  %v113_v21 = vand.u32 2147483648, %v107_v18  ;;  %vm112_vm3 = vcmp.eq.f32.partialorder %v107_v18, 0.0 }
  0xef   :  { %v164_v19 = vpop.eup %163 }
  0xf0   :  { %v109_v20 = vmul.f32 %v164_v19, %v107_v18 }
  0xf2   :  { %v111_v22 = vsel %vm110_vm2, %v107_v18, %v109_v20 }
  0xf3   :  { %v114_v23 = vsel %vm112_vm3, %v113_v21, %v111_v22 }
  0xf4   :  { %v115_v24 = vsub.f32 0.0, %v114_v23 }
  0xf6   :  { %v117_v25 = vsel %vm116_vm4, %v115_v24, -inf }
  0xf7   :  { %118 = vmax.xlane.f32.xlu0 %v117_v25 }
 0x184   :  { %v119_v26 = vpop.xlane.xlu0 %118 }
 0x185   :  { %v120_v27 = vsub.f32 %v115_v24, %v119_v26 }
 0x187   :  { %v121_v28 = vmul.f32 1.442695, %v120_v27 }
 0x189   :  { %165 = vpow2.f32 %v121_v28 }
 0x193   :  { %v166_v29 = vpop.eup %165 }
 0x194   :  { %v123_v30 = vsel %vm116_vm4, %v166_v29, 0.0 }
 0x195   :  { %124 = vadd.xlane.f32.xlu1 %v123_v30 }
 0x222   :  { %v125_v31 = vpop.xlane.xlu1 %124 }
 0x223   :  { %167 = vrcp.f32 %v125_v31 }
 0x22d   :  { %v168_v32 = vpop.eup %167 }
 0x22e   :  { %v127_v33 = vmul.f32 %v168_v32, %v125_v31 }
 0x230   :  { %v128_v34 = vsub.f32 2.0, %v127_v33 }
 0x232   :  { %v129_v35 = vmul.f32 %v168_v32, %v128_v34 }
 0x234   :  { %v130_v36 = vmul.f32 %v166_v29, %v129_v35 }
 0x236   :  { %131 = vst.msk [vmem:[%s219_s3] sm:$0xff] %vm116_vm4, %v130_v36 }

</bundles_post_ra>
